<compile_context>
chip_gen: v7x
topology: tpu7x:2x2x1
jax: 0.10.0
libtpu: 0.0.40
codegen_flags: <defaults>
</compile_context>

<pallas_src>
import jax
import jax.numpy as jnp
from jax.experimental import pallas as pl
from jax.experimental.pallas import tpu as pltpu


_CHUNK_ROWS = 128  # sub-chunk of the batch tile processed per inner-loop iteration


def _round_up(x, m):
    return ((x + m - 1) // m) * m


def fm_kernel(idx_ref, rhs_ref, w0_ref, out_ref):
    # idx_ref: [TILE_B, F]       int32 feature indices
    # rhs_ref: [N_pad, K+1]      fused table: [ V | W1 - 0.5*sum_k V^2 ]  (bf16 or f32)
    # w0_ref : [1, 1]            f32 SMEM scalar
    # out_ref: [TILE_B, 1]       f32
    tile_b, num_feats = idx_ref.shape
    n_pad, kp1 = rhs_ref.shape
    k_dim = kp1 - 1

    chunk = min(_CHUNK_ROWS, tile_b)
    n_chunks = tile_b // chunk          # wrapper guarantees tile_b % chunk == 0

    w0 = w0_ref[0, 0]

    # Lane masks: quadratic (V) lanes get 0.5 * fused^2, the last lane passes fused through.
    lane = jax.lax.broadcasted_iota(jnp.int32, (1, kp1), 1)
    half_mask = jnp.where(lane < k_dim, 0.5, 0.0)       # [1, K+1] f32
    lin_mask = jnp.where(lane == k_dim, 1.0, 0.0)       # [1, K+1] f32

    # Vocab ids as a single lane-dense row; broadcast over sublanes in the compare.
    vocab = jax.lax.broadcasted_iota(jnp.int32, (1, n_pad), 1)

    def process(row0):
        idx = idx_ref[pl.ds(row0, chunk), :]                         # [chunk, F] i32
        # Count matrix via int32 compare+add (no float select per field).
        counts_i = jnp.zeros((chunk, n_pad), jnp.int32)
        for f in range(num_feats):                                   # F is small & static
            counts_i = counts_i + (idx[:, f:f + 1] == vocab)
        counts = counts_i.astype(rhs_ref.dtype)                      # exact: counts <= F

        # Single fused MXU matmul; f32 accumulation.
        fused = jnp.dot(counts, rhs_ref[...],
                        preferred_element_type=jnp.float32)          # [chunk, K+1]

        # out = W0 + 0.5 * sum_k sum_v^2 + (linear_sum - 0.5 * sum_f sum_k V^2)
        combined = fused * (half_mask * fused + lin_mask)
        out_ref[pl.ds(row0, chunk), :] = (
            jnp.sum(combined, axis=-1, keepdims=True) + w0
        ).astype(out_ref.dtype)

    if n_chunks == 1:
        process(0)
    else:
        def body(c, carry):
            process(pl.multiple_of(c * chunk, chunk))
            return carry
        jax.lax.fori_loop(0, n_chunks, body, 0, unroll=True)


def fm_forward(inputs, W1_table, V_table, W0, *, rhs_dtype=jnp.bfloat16,
               max_tile_b=512, single_buffer_tables=False):
    """inputs: int [B, F]; W1_table: [N,1]; V_table: [N,K]; W0: [1]. Returns [B,1] f32."""
    B, F = inputs.shape
    N, K = V_table.shape

    # --- Fused RHS table, built once in the wrapper (hoists V*V out of the kernel). ---
    n_pad = _round_up(max(N, 1), 128)                # lane-dense vocab; zero rows inert
    v32 = V_table.astype(jnp.float32)
    lin_col = (W1_table.reshape(N, 1).astype(jnp.float32)
               - 0.5 * jnp.sum(v32 * v32, axis=-1, keepdims=True))      # [N, 1]
    rhs = jnp.zeros((n_pad, K + 1), jnp.float32)
    rhs = rhs.at[:N, :K].set(v32).at[:N, K:].set(lin_col)
    rhs = rhs.astype(rhs_dtype)

    # --- Batch tiling: >=2 tiles when possible (v7x dual-TC), 128-row chunk aligned. ---
    tb = min(max_tile_b, _round_up(pl.cdiv(B, 2), 8))
    if tb > _CHUNK_ROWS:
        tb = min(_round_up(tb, _CHUNK_ROWS), max_tile_b)
    tb = max(tb, 8)
    b_pad = _round_up(B, tb)
    idx = jnp.zeros((b_pad, F), jnp.int32).at[:B].set(inputs.astype(jnp.int32))
    grid = (b_pad // tb,)

    # Optional single-buffering of the resident table (large-vocab lever on v7x/v5e).
    rhs_pipeline = pl.Buffered(1) if single_buffer_tables else None

    # Explicit scoped-VMEM budget (v5e default is only 16 MiB); well under 64 MiB/TC.
    rhs_bytes = n_pad * (K + 1) * jnp.dtype(rhs_dtype).itemsize
    io_bytes = 2 * (tb * F * 4) + 2 * (tb * 4)
    resident_bytes = (1 if single_buffer_tables else 2) * rhs_bytes
    vmem_limit = int(min(max(io_bytes + resident_bytes + (16 << 20), 32 << 20), 64 << 20))

    out = pl.pallas_call(
        fm_kernel,
        out_shape=jax.ShapeDtypeStruct((b_pad, 1), jnp.float32),
        grid_spec=pltpu.PrefetchScalarGridSpec(
            num_scalar_prefetch=0,
            grid=grid,
            in_specs=[
                pl.BlockSpec((tb, F), lambda i: (i, 0)),                 # indices, tiled
                pl.BlockSpec((n_pad, K + 1), lambda i: (0, 0),           # fused RHS, resident
                             pipeline_mode=rhs_pipeline),
                pl.BlockSpec(memory_space=pltpu.MemorySpace.SMEM),       # W0 scalar
            ],
            out_specs=pl.BlockSpec((tb, 1), lambda i: (i, 0)),
        ),
        compiler_params=pltpu.CompilerParams(
            dimension_semantics=("parallel",),
            vmem_limit_bytes=vmem_limit,
        ),
    )(idx, rhs, W0.reshape(1, 1).astype(jnp.float32))

    return out[:B]


def fm_reference(inputs, W1_table, V_table, W0):
    """Pure-JAX reference mirroring the PyTorch FMLayer semantics (point_wise=True)."""
    w1 = W1_table[inputs]                               # [B, F, 1]
    x = V_table[inputs]                                 # [B, F, K]
    linear_part = jnp.sum(w1, axis=-2) + W0             # [B, 1]
    p1 = jnp.sum(x, axis=-2) ** 2
    p2 = jnp.sum(x ** 2, axis=-2)
    product_part = jnp.sum(p1 - p2, axis=-1, keepdims=True)
    return linear_part + 0.5 * product_part


def _run_case(name, B, F, K, N, key):
    k1, k2, k3, k4 = jax.random.split(key, 4)
    W1_table = jax.random.normal(k1, (N, 1), dtype=jnp.float32)
    V_table = jax.random.normal(k2, (N, K), dtype=jnp.float32)
    W0 = jax.random.normal(k3, (1,), dtype=jnp.float32)
    inputs = jax.random.randint(k4, (B, F), 0, N, dtype=jnp.int32)

    ref = fm_reference(inputs, W1_table, V_table, W0)

    # Bit-tight path: f32 RHS / f32 MXU accumulation.
    out_f32 = jax.block_until_ready(
        fm_forward(inputs, W1_table, V_table, W0, rhs_dtype=jnp.float32))
    assert out_f32.shape == (B, 1), (name, out_f32.shape)
    assert jnp.allclose(out_f32, ref, atol=5e-3, rtol=5e-3), (name, out_f32, ref)

    # Default fast path: bf16 RHS/counts on the MXU, f32 accumulation.
    out_bf16 = jax.block_until_ready(fm_forward(inputs, W1_table, V_table, W0))
    assert out_bf16.shape == (B, 1), (name, out_bf16.shape)
    # bf16 table rounding dominates this error; exactness is proven by the f32 path above.
    assert jnp.allclose(out_bf16, ref, atol=1.0, rtol=5e-2), (name, out_bf16, ref)


if __name__ == "__main__":
    root = jax.random.PRNGKey(0)
    key_small, key_large = jax.random.split(root, 2)
    # Small, module-consistent shapes: batch=8, fields=8, embed dim k=16, vocab n=100.
    _run_case("small", B=8, F=8, K=16, N=100, key=key_small)
    # Larger case exercising the multi-tile grid, the 128-row sub-chunk loop and padding.
    _run_case("large", B=600, F=8, K=16, N=1000, key=key_large)
    print("KERNEL_OK")
</pallas_src>

<mosaic_0001>
module attributes {stable_mosaic.version = 11 : i64} {
  func.func @fm_kernel(%arg0: i32, %arg1: memref<8x8xi32, #tpu.memory_space<vmem>>, %arg2: memref<128x17xf32, #tpu.memory_space<vmem>>, %arg3: memref<1x1xf32, #tpu.memory_space<smem>>, %arg4: memref<8x1xf32, #tpu.memory_space<vmem>>) attributes {dimension_semantics = [#tpu.dimension_semantics<parallel>], iteration_bounds = array<i64: 1>, scalar_prefetch = 0 : i64, scratch_operands = 0 : i64, tpu.core_type = #tpu.core_type<tc>, window_params = [{transform_indices = @transform_0, window_bounds = array<i64: 8, 8>}, {pipeline_mode = #tpu.pipeline_mode<synchronous>, transform_indices = @transform_1, window_bounds = array<i64: 128, 17>}, {transform_indices = @transform_2, window_bounds = array<i64: 1, 1>}, {transform_indices = @transform_3, window_bounds = array<i64: 8, 1>}]} {
    %c0 = arith.constant 0 : index
    %c0_0 = arith.constant 0 : index
    %0 = memref.load %arg3[%c0, %c0_0] : memref<1x1xf32, #tpu.memory_space<smem>>
    %1 = tpu.iota {dimensions = array<i32: 1>} : vector<1x17xi32>
    %c16_i32 = arith.constant 16 : i32
    %2 = vector.broadcast %c16_i32 : i32 to vector<1x17xi32>
    %3 = arith.cmpi slt, %1, %2 : vector<1x17xi32>
    %cst = arith.constant 5.000000e-01 : f32
    %cst_1 = arith.constant 0.000000e+00 : f32
    %4 = vector.broadcast %cst : f32 to vector<1x17xf32>
    %5 = vector.broadcast %cst_1 : f32 to vector<1x17xf32>
    %6 = arith.select %3, %4, %5 : vector<1x17xi1>, vector<1x17xf32>
    %c16_i32_2 = arith.constant 16 : i32
    %7 = vector.broadcast %c16_i32_2 : i32 to vector<1x17xi32>
    %8 = arith.cmpi eq, %1, %7 : vector<1x17xi32>
    %cst_3 = arith.constant 1.000000e+00 : f32
    %cst_4 = arith.constant 0.000000e+00 : f32
    %9 = vector.broadcast %cst_3 : f32 to vector<1x17xf32>
    %10 = vector.broadcast %cst_4 : f32 to vector<1x17xf32>
    %11 = arith.select %8, %9, %10 : vector<1x17xi1>, vector<1x17xf32>
    %12 = tpu.iota {dimensions = array<i32: 1>} : vector<1x128xi32>
    %c0_5 = arith.constant 0 : index
    %c0_6 = arith.constant 0 : index
    %13 = vector.load %arg1[%c0_5, %c0_6] : memref<8x8xi32, #tpu.memory_space<vmem>>, vector<8x8xi32>
    %c0_i32 = arith.constant 0 : i32
    %14 = vector.broadcast %c0_i32 : i32 to vector<8x128xi32>
    %15 = vector.extract_strided_slice %13 {offsets = [0, 0], sizes = [8, 1], strides = [1, 1]} : vector<8x8xi32> to vector<8x1xi32>
    %16 = vector.broadcast %15 : vector<8x1xi32> to vector<8x128xi32>
    %17 = vector.broadcast %12 : vector<1x128xi32> to vector<8x128xi32>
    %18 = arith.cmpi eq, %16, %17 : vector<8x128xi32>
    %19 = arith.extui %18 : vector<8x128xi1> to vector<8x128xi32>
    %20 = arith.addi %14, %19 : vector<8x128xi32>
    %21 = vector.extract_strided_slice %13 {offsets = [0, 1], sizes = [8, 1], strides = [1, 1]} : vector<8x8xi32> to vector<8x1xi32>
    %22 = vector.broadcast %21 : vector<8x1xi32> to vector<8x128xi32>
    %23 = vector.broadcast %12 : vector<1x128xi32> to vector<8x128xi32>
    %24 = arith.cmpi eq, %22, %23 : vector<8x128xi32>
    %25 = arith.extui %24 : vector<8x128xi1> to vector<8x128xi32>
    %26 = arith.addi %20, %25 : vector<8x128xi32>
    %27 = vector.extract_strided_slice %13 {offsets = [0, 2], sizes = [8, 1], strides = [1, 1]} : vector<8x8xi32> to vector<8x1xi32>
    %28 = vector.broadcast %27 : vector<8x1xi32> to vector<8x128xi32>
    %29 = vector.broadcast %12 : vector<1x128xi32> to vector<8x128xi32>
    %30 = arith.cmpi eq, %28, %29 : vector<8x128xi32>
    %31 = arith.extui %30 : vector<8x128xi1> to vector<8x128xi32>
    %32 = arith.addi %26, %31 : vector<8x128xi32>
    %33 = vector.extract_strided_slice %13 {offsets = [0, 3], sizes = [8, 1], strides = [1, 1]} : vector<8x8xi32> to vector<8x1xi32>
    %34 = vector.broadcast %33 : vector<8x1xi32> to vector<8x128xi32>
    %35 = vector.broadcast %12 : vector<1x128xi32> to vector<8x128xi32>
    %36 = arith.cmpi eq, %34, %35 : vector<8x128xi32>
    %37 = arith.extui %36 : vector<8x128xi1> to vector<8x128xi32>
    %38 = arith.addi %32, %37 : vector<8x128xi32>
    %39 = vector.extract_strided_slice %13 {offsets = [0, 4], sizes = [8, 1], strides = [1, 1]} : vector<8x8xi32> to vector<8x1xi32>
    %40 = vector.broadcast %39 : vector<8x1xi32> to vector<8x128xi32>
    %41 = vector.broadcast %12 : vector<1x128xi32> to vector<8x128xi32>
    %42 = arith.cmpi eq, %40, %41 : vector<8x128xi32>
    %43 = arith.extui %42 : vector<8x128xi1> to vector<8x128xi32>
    %44 = arith.addi %38, %43 : vector<8x128xi32>
    %45 = vector.extract_strided_slice %13 {offsets = [0, 5], sizes = [8, 1], strides = [1, 1]} : vector<8x8xi32> to vector<8x1xi32>
    %46 = vector.broadcast %45 : vector<8x1xi32> to vector<8x128xi32>
    %47 = vector.broadcast %12 : vector<1x128xi32> to vector<8x128xi32>
    %48 = arith.cmpi eq, %46, %47 : vector<8x128xi32>
    %49 = arith.extui %48 : vector<8x128xi1> to vector<8x128xi32>
    %50 = arith.addi %44, %49 : vector<8x128xi32>
    %51 = vector.extract_strided_slice %13 {offsets = [0, 6], sizes = [8, 1], strides = [1, 1]} : vector<8x8xi32> to vector<8x1xi32>
    %52 = vector.broadcast %51 : vector<8x1xi32> to vector<8x128xi32>
    %53 = vector.broadcast %12 : vector<1x128xi32> to vector<8x128xi32>
    %54 = arith.cmpi eq, %52, %53 : vector<8x128xi32>
    %55 = arith.extui %54 : vector<8x128xi1> to vector<8x128xi32>
    %56 = arith.addi %50, %55 : vector<8x128xi32>
    %57 = vector.extract_strided_slice %13 {offsets = [0, 7], sizes = [8, 1], strides = [1, 1]} : vector<8x8xi32> to vector<8x1xi32>
    %58 = vector.broadcast %57 : vector<8x1xi32> to vector<8x128xi32>
    %59 = vector.broadcast %12 : vector<1x128xi32> to vector<8x128xi32>
    %60 = arith.cmpi eq, %58, %59 : vector<8x128xi32>
    %61 = arith.extui %60 : vector<8x128xi1> to vector<8x128xi32>
    %62 = arith.addi %56, %61 : vector<8x128xi32>
    %63 = arith.sitofp %62 : vector<8x128xi32> to vector<8x128xf32>
    %c0_7 = arith.constant 0 : index
    %c0_8 = arith.constant 0 : index
    %64 = vector.load %arg2[%c0_7, %c0_8] : memref<128x17xf32, #tpu.memory_space<vmem>>, vector<128x17xf32>
    %cst_9 = arith.constant dense<0.000000e+00> : vector<8x17xf32>
    %65 = tpu.matmul %63, %64, %cst_9 {dimension_numbers = #tpu.dot_dimension_numbers<[1], [0], [0], [1], [0, 0, 1, 1], [], []>} : vector<8x128xf32>, vector<128x17xf32>, vector<8x17xf32> -> vector<8x17xf32>
    %66 = vector.broadcast %6 : vector<1x17xf32> to vector<8x17xf32>
    %67 = arith.mulf %66, %65 : vector<8x17xf32>
    %68 = vector.broadcast %11 : vector<1x17xf32> to vector<8x17xf32>
    %69 = arith.addf %67, %68 : vector<8x17xf32>
    %70 = arith.mulf %65, %69 : vector<8x17xf32>
    %cst_10 = arith.constant dense<0.000000e+00> : vector<8xf32>
    %71 = vector.multi_reduction <add>, %70, %cst_10 [1] : vector<8x17xf32> to vector<8xf32>
    %72 = vector.shape_cast %71 : vector<8xf32> to vector<8x1xf32>
    %73 = vector.broadcast %0 : f32 to vector<8x1xf32>
    %74 = arith.addf %72, %73 : vector<8x1xf32>
    %c0_11 = arith.constant 0 : index
    %c0_12 = arith.constant 0 : index
    %75 = vector.load %arg4[%c0_11, %c0_12] : memref<8x1xf32, #tpu.memory_space<vmem>>, vector<8x1xf32>
    tpu.vector_store %arg4[%c0_11, %c0_12], %74 {strides = array<i32>} : memref<8x1xf32, #tpu.memory_space<vmem>>, vector<8x1xf32>,
    return
  }
  func.func @transform_0(%arg0: i32) -> (i32, i32) {
    %c0_i32 = arith.constant 0 : i32
    %c0_i32_0 = arith.constant 0 : i32
    return %arg0, %c0_i32 : i32, i32
  }
  func.func @transform_1(%arg0: i32) -> (i32, i32) {
    %c0_i32 = arith.constant 0 : i32
    %c0_i32_0 = arith.constant 0 : i32
    %c0_i32_1 = arith.constant 0 : i32
    return %c0_i32, %c0_i32_0 : i32, i32
  }
  func.func @transform_2(%arg0: i32) -> (i32, i32) {
    %c0_i32 = arith.constant 0 : i32
    %c0_i32_0 = arith.constant 0 : i32
    %c0_i32_1 = arith.constant 0 : i32
    return %c0_i32, %c0_i32_0 : i32, i32
  }
  func.func @transform_3(%arg0: i32) -> (i32, i32) {
    %c0_i32 = arith.constant 0 : i32
    %c0_i32_0 = arith.constant 0 : i32
    return %arg0, %c0_i32 : i32, i32
  }
}

</mosaic_0001>

<bundles_post_ra>
// kernel: tpu_custom_call.1
= control target key start
LH: loop header
LB: loop body
LE: loop exit
PB: predicated region body
PF: predicated region fallthrough
CT: control target
= control target key end

     0   :  { %v268_v0 = vmov 2   ;;  %v269_v1 = vmov 0   ;;  %v270_v7 = vmov 0.0|0.0   ;;  %v271_v10 = vmov 3   ;;  %s365_s0 = inlined_call_operand.vmem [shape: s32[8,8], index: 0, kind: input, shape index: {}]   ;;  %s366_s1 = inlined_call_operand.vmem [shape: f32[128,17], index: 1, kind: input, shape index: {}]   ;;  %s367_s2 = inlined_call_operand.<no memory space> [shape: f32[1,1], index: 2, kind: input, shape index: {}]   ;;  %s368_s3 = inlined_call_operand.vmem [shape: f32[8,1], index: 3, kind: output, shape index: {}]  }
   0x1   :  { %261 = vset.pattern.permute.xlu1 %v268_v0  ;;  %259 = vset.pattern.permute.xlu0 %v269_v1  ;;  %v22_v2 = vld [vmem:[%s365_s0] sm:$0xff]  ;;  %v72_v4 = vld [vmem:[%s366_s1 + $0x8] sm:$0xff]  ;;  %v73_v5 = vld [vmem:[%s366_s1 + $0x10] sm:$0xff]  ;;  %v272_v11 = vmov 1   ;;  %v273_v17 = vmov 4   ;;  %v274_v18 = vmov 5   ;;  %v16_v35 = vlaneseq }
   0x2   :  { %v71_v3 = vld [vmem:[%s366_s1] sm:$0xff]  ;;  %35 = vperm.xlu1 %261, %v22_v2   ;;  %24 = vperm.xlu0 %259, %v22_v2   ;;  %v74_v6 = vld [vmem:[%s366_s1 + $0x18] sm:$0xff]  ;;  %v76_v13 = vld [vmem:[%s366_s1 + $0x28] sm:$0xff]  ;;  %v275_v22 = vmov 6   ;;  %v276_v23 = vmov 7   ;;  %vm277_vm0 = vmmov 0  }
   0x3   :  { %224 = vmatprep.subr.bf16.mxu0 %v270_v7  ;;  %v225_v8 = vpack.c.bf16 %v72_v4, %v71_v3  ;;  %v228_v9 = vpack.c.bf16 %v74_v6, %v73_v5  ;;  %v75_v12 = vld [vmem:[%s366_s1 + $0x20] sm:$0xff]  ;;  %v77_v15 = vld [vmem:[%s366_s1 + $0x30] sm:$0xff]  ;;  %v78_v16 = vld [vmem:[%s366_s1 + $0x38] sm:$0xff]  ;;  %v278_v33 = vmov 0.0   ;;  %v17_v38 = vand.u32 127, %v16_v35 }
   0x4   :  { %v231_v14 = vpack.c.bf16 %v76_v13, %v75_v12  ;;  %v234_v19 = vpack.c.bf16 %v78_v16, %v77_v15  ;;  %v79_v20 = vld [vmem:[%s366_s1 + $0x40] sm:$0xff]  ;;  %v80_v21 = vld [vmem:[%s366_s1 + $0x48] sm:$0xff]  ;;  %v81_v25 = vld [vmem:[%s366_s1 + $0x50] sm:$0xff]  ;;  %221 = vmatprep.mubr.msk.f32.mxu0 %vm277_vm0, %v278_v33  ;;  %vm160_vm11 = vcmask 138240   ;;  %v164_v6 = vstv %s367_s2 }
   0x5   :  { %226 = vmatpush3.bf16.msra.mxu0 %v225_v8  ;;  %v237_v24 = vpack.c.bf16 %v80_v21, %v79_v20  ;;  %v82_v26 = vld [vmem:[%s366_s1 + $0x58] sm:$0xff]  ;;  %v83_v28 = vld [vmem:[%s366_s1 + $0x60] sm:$0xff]  ;;  %v84_v29 = vld [vmem:[%s366_s1 + $0x68] sm:$0xff]  ;;  %vm18_vm9 = vcmp.lt.s32.totalorder %v17_v38, 16  ;;  %vm20_vm10 = vcmp.eq.s32.totalorder %v17_v38, 16  ;;  %vm166_vm12 = vcmask 7168  }
   0x6   :  { %262 = vset.pattern.permute.xlu1 %v271_v10  ;;  %260 = vset.pattern.permute.xlu0 %v272_v11  ;;  %v240_v27 = vpack.c.bf16 %v82_v26, %v81_v25  ;;  %v243_v30 = vpack.c.bf16 %v84_v29, %v83_v28  ;;  %v85_v31 = vld [vmem:[%s366_s1 + $0x70] sm:$0xff]  ;;  %v86_v32 = vld [vmem:[%s366_s1 + $0x78] sm:$0xff]  ;;  %v19_v61 = vsel %vm18_vm9, 0.5, %v278_v33  ;;  %v21_v62 = vsel %vm20_vm10, 1.0, %v278_v33 }
   0x7   :  { %41 = vperm.xlu1 %262, %v22_v2   ;;  %29 = vperm.xlu0 %260, %v22_v2   ;;  %v246_v34 = vpack.c.bf16 %v86_v32, %v85_v31 }
   0x8   :  { %227 = vmatprep.subr.bf16.mxu0 %v270_v7 }
   0x9   :  { %229 = vmatpush3.bf16.msra.mxu0 %v228_v9 }
   0xa   :  { %230 = vmatprep.subr.bf16.mxu0 %v270_v7 }
   0xb   :  { %263 = vset.pattern.permute.xlu1 %v273_v17  ;;  %264 = vset.pattern.permute.xlu0 %v274_v18 }
   0xc   :  { %47 = vperm.xlu1 %263, %v22_v2   ;;  %53 = vperm.xlu0 %264, %v22_v2  }
   0xd   :  { %232 = vmatpush3.bf16.msra.mxu0 %v231_v14 }
   0xe   :  { %233 = vmatprep.subr.bf16.mxu0 %v270_v7 }
  0x10   :  { %265 = vset.pattern.permute.xlu1 %v275_v22  ;;  %267 = vset.pattern.permute.xlu0 %v276_v23 }
  0x11   :  { %59 = vperm.xlu1 %265, %v22_v2   ;;  %235 = vmatpush3.bf16.msra.mxu0 %v234_v19 }
  0x12   :  { %236 = vmatprep.subr.bf16.mxu0 %v270_v7 }
  0x15   :  { %266 = vset.pattern.permute.xlu1 %v276_v23  ;;  %238 = vmatpush3.bf16.msra.mxu0 %v237_v24 }
  0x16   :  { %65 = vperm.xlu1 %266, %v22_v2   ;;  %239 = vmatprep.subr.bf16.mxu0 %v270_v7 }
  0x19   :  { %241 = vmatpush3.bf16.msra.mxu0 %v240_v27 }
  0x1a   :  { %242 = vmatprep.subr.bf16.mxu0 %v270_v7 }
  0x1d   :  { %244 = vmatpush3.bf16.msra.mxu0 %v243_v30 }
  0x1e   :  { %245 = vmatprep.subr.bf16.mxu0 %v270_v7 }
  0x21   :  { %247 = vmatpush3.bf16.msra.mxu0 %v246_v34 }
  0x81   :  { %v36_v36 = vpop.permute.xlu1 %35  ;;  %v25_v37 = vpop.permute.xlu0 %24 }
  0x82   :  { %vm26_vm1 = vcmp.eq.s32.totalorder %v25_v37, %v17_v38  ;;  %vm37_vm2 = vcmp.eq.s32.totalorder %v36_v36, %v17_v38 }
  0x83   :  { %v27_v41 = vsel %vm26_vm1, 1, %v269_v1  ;;  %v38_v44 = vsel %vm37_vm2, 1, %v269_v1 }
  0x86   :  { %v42_v39 = vpop.permute.xlu1 %41  ;;  %v30_v40 = vpop.permute.xlu0 %29 }
  0x87   :  { %vm31_vm3 = vcmp.eq.s32.totalorder %v30_v40, %v17_v38  ;;  %vm43_vm4 = vcmp.eq.s32.totalorder %v42_v39, %v17_v38 }
  0x88   :  { %v32_v42 = vsel %vm31_vm3, 1, %v269_v1  ;;  %v44_v48 = vsel %vm43_vm4, 1, %v269_v1 }
  0x89   :  { %v33_v43 = vadd.s32 %v32_v42, %v27_v41 }
  0x8b   :  { %v39_v45 = vadd.s32 %v38_v44, %v33_v43  ;;  %v48_v46 = vpop.permute.xlu1 %47  ;;  %v54_v47 = vpop.permute.xlu0 %53 }
  0x8c   :  { %vm49_vm5 = vcmp.eq.s32.totalorder %v48_v46, %v17_v38  ;;  %vm55_vm6 = vcmp.eq.s32.totalorder %v54_v47, %v17_v38 }
  0x8d   :  { %v45_v49 = vadd.s32 %v44_v48, %v39_v45  ;;  %v50_v50 = vsel %vm49_vm5, 1, %v269_v1  ;;  %v56_v52 = vsel %vm55_vm6, 1, %v269_v1 }
  0x8f   :  { %v51_v51 = vadd.s32 %v50_v50, %v45_v49 }
  0x90   :  { %v60_v53 = vpop.permute.xlu1 %59 }
  0x91   :  { %vm61_vm7 = vcmp.eq.s32.totalorder %v60_v53, %v17_v38  ;;  %v57_v54 = vadd.s32 %v56_v52, %v51_v51 }
  0x92   :  { %v62_v55 = vsel %vm61_vm7, 1, %v269_v1 }
  0x93   :  { %v63_v57 = vadd.s32 %v62_v55, %v57_v54 }
  0x95   :  { %v66_v56 = vpop.permute.xlu1 %65 }
  0x96   :  { %vm67_vm8 = vcmp.eq.s32.totalorder %v66_v56, %v17_v38 }
  0x97   :  { %v68_v58 = vsel %vm67_vm8, 1, %v269_v1 }
  0x98   :  { %v69_v59 = vadd.s32 %v68_v58, %v63_v57 }
  0x9a   :  { %v70_v60 = vcvt.s32.f32 %v69_v59 }
  0x9c   :  { %222 = vmatmul.mubr.f32.vlgmr.msra.gmra.mrb[0].mxu0 %v70_v60 }
 0x16f   :  { %v153_v63 = vpop.f32.mrb[0].mxu0 }
 0x170   :  { %v157_v0 = vmul.f32 %v153_v63, %v19_v61  ;;  %v223_v2 = vpop.f32.mrb[1].mxu0 }
 0x172   :  { %v158_v3 = vadd.f32 %v157_v0, %v21_v62 }
 0x174   :  { %v159_v4 = vmul.f32 %v158_v3, %v153_v63 }
 0x176   :  { %v161_v5 = vsel %vm160_vm11, %v159_v4, 0.0 }
 0x177   :  { %162 = vadd.xlane.f32.xlu0 %v161_v5 }
 0x204   :  { %v163_v1 = vpop.xlane.xlu0 %162 }
 0x205   :  { %v165_v7 = vadd.f32 %v164_v6, %v163_v1 }
 0x207   :  { %167 = vst.msk [vmem:[%s368_s3] sm:$0xff] %vm166_vm12, %v165_v7 }

</bundles_post_ra>
